<compile_context>
chip_gen: v6e
topology: v6e:2x2x1
jax: 0.10.0
libtpu: 0.0.40
codegen_flags: <defaults>
</compile_context>

<pallas_src>
import functools

import jax
import jax.numpy as jnp
from jax import lax
from jax.experimental import pallas as pl
from jax.experimental.pallas import tpu as pltpu

LANE = 128


def _round_up(n, m):
    return ((n + m - 1) // m) * m


def se_kernel(x_ref, w1_ref, b1_ref, w2_ref, b2_ref, o_ref, acc_ref, *, inv_hw):
    # x_ref : (Bt, C, THW)  activation tile, spatial on the lane axis
    # w1_ref: (Ch, C)  b1_ref: (1, Ch)   (PyTorch nn.Linear (out, in) layout)
    # w2_ref: (C, Ch)  b2_ref: (1, C)
    # o_ref : (Bt, 1, C)                 gating weights (sigmoid output)
    # acc_ref: (Bt, C, 128) f32 running partial spatial sums (VMEM scratch)
    s = pl.program_id(1)

    @pl.when(s == 0)
    def _init():
        acc_ref[...] = jnp.zeros_like(acc_ref)

    # --- squeeze (partial): accumulate aligned 128-lane chunks with VPU adds.
    # No per-step cross-lane reduce; the single XLU reduce happens in the
    # epilogue, so the only busy path here is the DMA / vld stream of x.
    thw = x_ref.shape[-1]
    partial = x_ref[:, :, 0:LANE].astype(jnp.float32)
    for j in range(1, thw // LANE):
        partial = partial + x_ref[:, :, j * LANE:(j + 1) * LANE].astype(jnp.float32)
    acc_ref[...] += partial

    # --- epilogue on the last spatial tile: reduce + excite ---
    @pl.when(s == pl.num_programs(1) - 1)
    def _finish():
        # Zero-padded lanes contribute 0 to the sum; divide by the true H*W.
        pooled = jnp.sum(acc_ref[...], axis=-1) * inv_hw            # (Bt, C)
        h = lax.dot_general(
            pooled, w1_ref[...],
            dimension_numbers=(((1,), (1,)), ((), ())),             # pooled @ w1.T
            preferred_element_type=jnp.float32) + b1_ref[...]
        h = jnp.maximum(h, 0.0)
        y = lax.dot_general(
            h, w2_ref[...],
            dimension_numbers=(((1,), (1,)), ((), ())),             # h @ w2.T
            preferred_element_type=jnp.float32) + b2_ref[...]
        o_ref[...] = jax.nn.sigmoid(y)[:, None, :].astype(o_ref.dtype)


def se_forward(x, w1, b1, w2, b2, *, block_hw=None, block_b=1):
    """SE forward.

    x : (B, C, H, W)
    w1: (C//r, C)   b1: (C//r,)     (PyTorch nn.Linear weight layout (out, in))
    w2: (C, C//r)   b2: (C,)
    returns: (B, C, 1, 1) — the sigmoid gate, matching the PyTorch module.
    """
    B, C, H, W = x.shape
    Ch = w1.shape[0]
    HW = H * W

    bt = max(1, min(int(block_b), B))
    b_pad = _round_up(B, bt)

    itemsize = jnp.dtype(x.dtype).itemsize
    # Spatial tile: lane-dense multiple of 128, targeting ~4 MiB per x buffer so
    # double buffering stays far below the 32 MiB scoped-VMEM default (v6e/v7x).
    if block_hw is None:
        block_hw = (4 << 20) // max(1, bt * C * itemsize)
    block_hw = max(LANE, (int(block_hw) // LANE) * LANE)
    thw = min(_round_up(HW, LANE), block_hw)
    hw_pad = _round_up(HW, thw)
    num_s = hw_pad // thw

    x_flat = x.reshape(B, C, HW)
    if hw_pad != HW or b_pad != B:
        x_flat = jnp.pad(x_flat, ((0, b_pad - B), (0, 0), (0, hw_pad - HW)))

    b1_2d = b1.reshape(1, Ch)
    b2_2d = b2.reshape(1, C)

    # VMEM budget: 2x double-buffered x tile + resident weights + scratch + out,
    # plus headroom; clamped so we never exceed what v7x (64 MiB phys) can take.
    block_x_bytes = bt * C * thw * itemsize
    weight_bytes = (2 * Ch * C + Ch + C) * 4
    scratch_bytes = bt * C * LANE * 4
    vmem_limit = int(min(
        max(2 * block_x_bytes + weight_bytes + scratch_bytes + (4 << 20), 16 << 20),
        48 << 20))

    cost = pl.CostEstimate(
        flops=int(B * C * HW + 4 * B * C * Ch),
        transcendentals=int(B * (C + Ch)),
        bytes_accessed=int(x_flat.size * itemsize + weight_bytes
                           + B * C * itemsize),
    )

    kernel = functools.partial(se_kernel, inv_hw=float(1.0 / HW))

    out = pl.pallas_call(
        kernel,
        out_shape=jax.ShapeDtypeStruct((b_pad, 1, C), x.dtype),
        grid_spec=pltpu.PrefetchScalarGridSpec(
            num_scalar_prefetch=0,
            grid=(b_pad // bt, num_s),
            in_specs=[
                pl.BlockSpec((bt, C, thw), lambda b, s: (b, 0, s)),
                # Tiny weights: whole-array blocks, grid-invariant index maps
                # -> DMA'd once, VMEM-resident across all grid steps.
                pl.BlockSpec((Ch, C), lambda b, s: (0, 0)),
                pl.BlockSpec((1, Ch), lambda b, s: (0, 0)),
                pl.BlockSpec((C, Ch), lambda b, s: (0, 0)),
                pl.BlockSpec((1, C), lambda b, s: (0, 0)),
            ],
            out_specs=pl.BlockSpec((bt, 1, C), lambda b, s: (b, 0, 0)),
            scratch_shapes=[pltpu.VMEM((bt, C, LANE), jnp.float32)],
        ),
        compiler_params=pltpu.CompilerParams(
            dimension_semantics=("parallel", "arbitrary"),
            vmem_limit_bytes=vmem_limit,
        ),
        cost_estimate=cost,
    )(x_flat, w1, b1_2d, w2, b2_2d)

    return out[:B, 0, :].reshape(B, C, 1, 1)


def reference_se(x, w1, b1, w2, b2):
    """Pure-JAX reference matching the PyTorch semantics."""
    B, C, H, W = x.shape
    pooled = jnp.mean(x, axis=(2, 3))                 # (B, C)
    h = jnp.maximum(pooled @ w1.T + b1, 0.0)          # (B, C//r)
    y = jax.nn.sigmoid(h @ w2.T + b2)                 # (B, C)
    return y.reshape(B, C, 1, 1)


if __name__ == "__main__":
    # Shapes consistent with the module: planes=64, r=16 -> hidden=4.
    B, C, H, W = 2, 64, 8, 8
    r = 16
    Ch = C // r

    key = jax.random.PRNGKey(0)
    kx, kw1, kb1, kw2, kb2, kx2 = jax.random.split(key, 6)

    x = jax.random.normal(kx, (B, C, H, W), dtype=jnp.float32)
    # PyTorch Linear weight layout: (out, in).
    w1 = jax.random.normal(kw1, (Ch, C), dtype=jnp.float32) * 0.1
    b1 = jax.random.normal(kb1, (Ch,), dtype=jnp.float32) * 0.1
    w2 = jax.random.normal(kw2, (C, Ch), dtype=jnp.float32) * 0.1
    b2 = jax.random.normal(kb2, (C,), dtype=jnp.float32) * 0.1

    out = se_forward(x, w1, b1, w2, b2)
    out = jax.block_until_ready(out)
    ref = reference_se(x, w1, b1, w2, b2)
    assert out.shape == (B, C, 1, 1), out.shape
    assert jnp.allclose(out, ref, atol=1e-5, rtol=1e-5), "mismatch vs reference"

    # Second check: non-multiple-of-128 spatial size with a forced small
    # spatial tile, exercising padding + the multi-step accumulator path.
    x2 = jax.random.normal(kx2, (3, C, 20, 20), dtype=jnp.float32)
    out2 = se_forward(x2, w1, b1, w2, b2, block_hw=256)
    out2 = jax.block_until_ready(out2)
    ref2 = reference_se(x2, w1, b1, w2, b2)
    assert out2.shape == (3, C, 1, 1), out2.shape
    assert jnp.allclose(out2, ref2, atol=1e-5, rtol=1e-5), "mismatch vs reference (tiled)"

    print("KERNEL_OK")
</pallas_src>

<mosaic_0001>
module attributes {stable_mosaic.version = 11 : i64} {
  func.func @se_kernel(%arg0: i32, %arg1: i32, %arg2: memref<1x64x128xf32, #tpu.memory_space<vmem>>, %arg3: memref<4x64xf32, #tpu.memory_space<vmem>>, %arg4: memref<1x4xf32, #tpu.memory_space<vmem>>, %arg5: memref<64x4xf32, #tpu.memory_space<vmem>>, %arg6: memref<1x64xf32, #tpu.memory_space<vmem>>, %arg7: memref<1x1x64xf32, #tpu.memory_space<vmem>>, %arg8: memref<1x64x128xf32, #tpu.memory_space<vmem>>) attributes {dimension_semantics = [#tpu.dimension_semantics<parallel>, #tpu.dimension_semantics<arbitrary>], iteration_bounds = array<i64: 2, 1>, scalar_prefetch = 0 : i64, scratch_operands = 1 : i64, tpu.core_type = #tpu.core_type<tc>, window_params = [{transform_indices = @transform_0, window_bounds = array<i64: 1, 64, 128>}, {pipeline_mode = #tpu.pipeline_mode<synchronous>, transform_indices = @transform_1, window_bounds = array<i64: 4, 64>}, {pipeline_mode = #tpu.pipeline_mode<synchronous>, transform_indices = @transform_2, window_bounds = array<i64: 1, 4>}, {pipeline_mode = #tpu.pipeline_mode<synchronous>, transform_indices = @transform_3, window_bounds = array<i64: 64, 4>}, {pipeline_mode = #tpu.pipeline_mode<synchronous>, transform_indices = @transform_4, window_bounds = array<i64: 1, 64>}, {transform_indices = @transform_5, window_bounds = array<i64: 1, 1, 64>}]} {
    %c0_i32 = arith.constant 0 : i32
    %0 = arith.cmpi eq, %arg1, %c0_i32 : i32
    %1 = arith.extui %0 : i1 to i32
    %c0_i32_0 = arith.constant 0 : i32
    %2 = arith.cmpi ne, %1, %c0_i32_0 : i32
    scf.if %2 {
      %cst = arith.constant 0.000000e+00 : f32
      %10 = vector.broadcast %cst : f32 to vector<1x64x128xf32>
      %c0_11 = arith.constant 0 : index
      %c0_12 = arith.constant 0 : index
      %c0_13 = arith.constant 0 : index
      %11 = vector.load %arg8[%c0_11, %c0_12, %c0_13] : memref<1x64x128xf32, #tpu.memory_space<vmem>>, vector<1x64x128xf32>
      tpu.vector_store %arg8[%c0_11, %c0_12, %c0_13], %10 {strides = array<i32>} : memref<1x64x128xf32, #tpu.memory_space<vmem>>, vector<1x64x128xf32>,
    } else {
    }
    %c0 = arith.constant 0 : index
    %c0_1 = arith.constant 0 : index
    %c0_2 = arith.constant 0 : index
    %3 = vector.load %arg2[%c0, %c0_1, %c0_2] : memref<1x64x128xf32, #tpu.memory_space<vmem>>, vector<1x64x128xf32>
    %c0_3 = arith.constant 0 : index
    %c0_4 = arith.constant 0 : index
    %c0_5 = arith.constant 0 : index
    %4 = vector.load %arg8[%c0_3, %c0_4, %c0_5] : memref<1x64x128xf32, #tpu.memory_space<vmem>>, vector<1x64x128xf32>
    %5 = arith.addf %4, %3 : vector<1x64x128xf32>
    %c0_6 = arith.constant 0 : index
    %c0_7 = arith.constant 0 : index
    %c0_8 = arith.constant 0 : index
    %6 = vector.load %arg8[%c0_6, %c0_7, %c0_8] : memref<1x64x128xf32, #tpu.memory_space<vmem>>, vector<1x64x128xf32>
    tpu.vector_store %arg8[%c0_6, %c0_7, %c0_8], %5 {strides = array<i32>} : memref<1x64x128xf32, #tpu.memory_space<vmem>>, vector<1x64x128xf32>,
    %c0_i32_9 = arith.constant 0 : i32
    %7 = arith.cmpi eq, %arg1, %c0_i32_9 : i32
    %8 = arith.extui %7 : i1 to i32
    %c0_i32_10 = arith.constant 0 : i32
    %9 = arith.cmpi ne, %8, %c0_i32_10 : i32
    scf.if %9 {
      %c0_11 = arith.constant 0 : index
      %c0_12 = arith.constant 0 : index
      %c0_13 = arith.constant 0 : index
      %10 = vector.load %arg8[%c0_11, %c0_12, %c0_13] : memref<1x64x128xf32, #tpu.memory_space<vmem>>, vector<1x64x128xf32>
      %cst = arith.constant dense<0.000000e+00> : vector<1x64xf32>
      %11 = vector.multi_reduction <add>, %10, %cst [2] : vector<1x64x128xf32> to vector<1x64xf32>
      %cst_14 = arith.constant 1.562500e-02 : f32
      %12 = vector.broadcast %cst_14 : f32 to vector<1x64xf32>
      %13 = arith.mulf %11, %12 : vector<1x64xf32>
      %c0_15 = arith.constant 0 : index
      %c0_16 = arith.constant 0 : index
      %14 = vector.load %arg3[%c0_15, %c0_16] : memref<4x64xf32, #tpu.memory_space<vmem>>, vector<4x64xf32>
      %cst_17 = arith.constant dense<0.000000e+00> : vector<1x4xf32>
      %15 = tpu.matmul %13, %14, %cst_17 {dimension_numbers = #tpu.dot_dimension_numbers<[1], [1], [0], [0], [0, 0, 1, 0], [], []>} : vector<1x64xf32>, vector<4x64xf32>, vector<1x4xf32> -> vector<1x4xf32>
      %c0_18 = arith.constant 0 : index
      %c0_19 = arith.constant 0 : index
      %16 = vector.load %arg4[%c0_18, %c0_19] : memref<1x4xf32, #tpu.memory_space<vmem>>, vector<1x4xf32>
      %17 = arith.addf %15, %16 : vector<1x4xf32>
      %cst_20 = arith.constant 0.000000e+00 : f32
      %18 = vector.broadcast %cst_20 : f32 to vector<1x4xf32>
      %19 = arith.maximumf %17, %18 : vector<1x4xf32>
      %c0_21 = arith.constant 0 : index
      %c0_22 = arith.constant 0 : index
      %20 = vector.load %arg5[%c0_21, %c0_22] : memref<64x4xf32, #tpu.memory_space<vmem>>, vector<64x4xf32>
      %cst_23 = arith.constant dense<0.000000e+00> : vector<1x64xf32>
      %21 = tpu.matmul %19, %20, %cst_23 {dimension_numbers = #tpu.dot_dimension_numbers<[1], [1], [0], [0], [0, 0, 1, 0], [], []>} : vector<1x4xf32>, vector<64x4xf32>, vector<1x64xf32> -> vector<1x64xf32>
      %c0_24 = arith.constant 0 : index
      %c0_25 = arith.constant 0 : index
      %22 = vector.load %arg6[%c0_24, %c0_25] : memref<1x64xf32, #tpu.memory_space<vmem>>, vector<1x64xf32>
      %23 = arith.addf %21, %22 : vector<1x64xf32>
      %24 = arith.negf %23 : vector<1x64xf32>
      %25 = math.exp %24 : vector<1x64xf32>
      %cst_26 = arith.constant 1.000000e+00 : f32
      %26 = vector.broadcast %cst_26 : f32 to vector<1x64xf32>
      %27 = arith.addf %26, %25 : vector<1x64xf32>
      %28 = arith.divf %26, %27 : vector<1x64xf32>
      %29 = vector.shape_cast %28 : vector<1x64xf32> to vector<1x1x64xf32>
      %c0_27 = arith.constant 0 : index
      %c0_28 = arith.constant 0 : index
      %c0_29 = arith.constant 0 : index
      %30 = vector.load %arg7[%c0_27, %c0_28, %c0_29] : memref<1x1x64xf32, #tpu.memory_space<vmem>>, vector<1x1x64xf32>
      tpu.vector_store %arg7[%c0_27, %c0_28, %c0_29], %29 {strides = array<i32>} : memref<1x1x64xf32, #tpu.memory_space<vmem>>, vector<1x1x64xf32>,
    } else {
    }
    return
  }
  func.func @transform_0(%arg0: i32, %arg1: i32) -> (i32, i32, i32) {
    %c0_i32 = arith.constant 0 : i32
    %c0_i32_0 = arith.constant 0 : i32
    return %arg0, %c0_i32, %arg1 : i32, i32, i32
  }
  func.func @transform_1(%arg0: i32, %arg1: i32) -> (i32, i32) {
    %c0_i32 = arith.constant 0 : i32
    %c0_i32_0 = arith.constant 0 : i32
    %c0_i32_1 = arith.constant 0 : i32
    return %c0_i32, %c0_i32_0 : i32, i32
  }
  func.func @transform_2(%arg0: i32, %arg1: i32) -> (i32, i32) {
    %c0_i32 = arith.constant 0 : i32
    %c0_i32_0 = arith.constant 0 : i32
    %c0_i32_1 = arith.constant 0 : i32
    return %c0_i32, %c0_i32_0 : i32, i32
  }
  func.func @transform_3(%arg0: i32, %arg1: i32) -> (i32, i32) {
    %c0_i32 = arith.constant 0 : i32
    %c0_i32_0 = arith.constant 0 : i32
    %c0_i32_1 = arith.constant 0 : i32
    return %c0_i32, %c0_i32_0 : i32, i32
  }
  func.func @transform_4(%arg0: i32, %arg1: i32) -> (i32, i32) {
    %c0_i32 = arith.constant 0 : i32
    %c0_i32_0 = arith.constant 0 : i32
    %c0_i32_1 = arith.constant 0 : i32
    return %c0_i32, %c0_i32_0 : i32, i32
  }
  func.func @transform_5(%arg0: i32, %arg1: i32) -> (i32, i32, i32) {
    %c0_i32 = arith.constant 0 : i32
    %c0_i32_0 = arith.constant 0 : i32
    %c0_i32_1 = arith.constant 0 : i32
    return %arg0, %c0_i32, %c0_i32_0 : i32, i32, i32
  }
}

</mosaic_0001>

<bundles_post_ra>
// kernel: tpu_custom_call.1
= control target key start
LH: loop header
LB: loop body
LE: loop exit
PB: predicated region body
PF: predicated region fallthrough
CT: control target
= control target key end

     0   :  { %10 = vsyncpa [#allocation4], 0  ;;  %s1141_s0 = inlined_call_operand.hbm [shape: f32[2,64,128], index: 0, kind: input, shape index: {}]   ;;  %s1142_s1 = inlined_call_operand.vmem [shape: f32[4,64], index: 1, kind: input, shape index: {}]   ;;  %s1143_s2 = inlined_call_operand.vmem [shape: f32[1,4], index: 2, kind: input, shape index: {}]   ;;  %s1144_s3 = inlined_call_operand.vmem [shape: f32[64,4], index: 3, kind: input, shape index: {}]   ;;  %s1145_s4 = inlined_call_operand.vmem [shape: f32[1,64], index: 4, kind: input, shape index: {}]   ;;  %s1146_s5 = inlined_call_operand.hbm [shape: f32[2,1,64], index: 5, kind: output, shape index: {}]  }
   0x1   :  { %12 = vsyncpa [#allocation4 + $0x1], 0 }
   0x2   :  { %13 = vsyncpa [#allocation5], 0 }
   0x3   :  { %15 = vsyncpa [#allocation5 + $0x1], 0  ;;  %s958_s18 = smov 0   ;;  %s960_s19 = smov 0  }
   0x4   :  { %s962_s20 = smov 0   ;;  %s964_s21 = smov 0  }
   0x5   :  { %s966_s22 = smov 0   ;;  %s968_s23 = smov 0  }
   0x6 LB: > { %s682_s24 = sadd.s32 4294967295, %s920_s23   ;;  %s683_s25 = sadd.s32 4294967294, %s920_s23   ;;  %s920_s23 = sphi %s968_s23, %s21_s23   ;;  %s916_s22 = sphi %s966_s22, %s1157_s22   ;;  %s912_s21 = sphi %s964_s21, %s1156_s21   ;;  %s908_s20 = sphi %s962_s20, %s1155_s20   ;;  %s904_s19 = sphi %s960_s19, %s1154_s19   ;;  %s900_s18 = sphi %s958_s18, %s1153_s18  }
   0x7   : > { %s33_s26 = sadd.s32 1, %s916_s22  ;;  %s42_s27 = sadd.s32 1, %s908_s20 }
   0x8   : > { %p35_p0 = scmp.ge.s32.totalorder %s33_s26, 2  ;;  %p49_p1 = scmp.ne.s32.totalorder %s908_s20, %s904_s19 }
   0x9   : > { %p50_p2 = scmp.eq.s32.totalorder %s920_s23, 0  ;;  %p55_p3 = scmp.ne.s32.totalorder %s904_s19, %s900_s18 }
   0xa   : > { %s1159_s26 = smov (%p35_p0, %s33_s26), 0  ;;  %p56_p5 = scmp.eq.s32.totalorder %s682_s24, 0 }
   0xb   : > { %p999_p4 = por %p50_p2, %p49_p1  ;;  %s37_s29 = ssub.s32 %s916_s22, %s1159_s26 }
   0xc   : > { %p163_p6 = scmp.eq.s32.totalorder %s682_s24, 1  ;;  %p40_p7 = scmp.eq.s32.totalorder %s37_s29, 0 }
   0xd   : > { %p1005_p8 = por %p56_p5, %p55_p3  ;;  %p169_p10 = scmp.eq.s32.totalorder %s683_s25, 1 }
   0xe   : > { %p1009_p9 = por %p163_p6, %p49_p1  ;;  %p754_p13 = scmp.lt.s32.totalorder %s920_s23, 2 }
   0xf   : > { %s1014_s7 = scalar_select %p40_p7, %s908_s20, %s42_s27  }
  0x10   : > { %p1016_p11 = por %p169_p10, %p55_p3  ;;  %s201_s9 = sand.u32 1, %s908_s20  }
  0x11   : > { %s686_s10 = sshll.u32 %s201_s9, 6  ;;  %s706_s11 = sshll.u32 %s916_s22, 10 }
  0x12   : > { %s212_s14 = scalar_lea.hbm %s1141_s0, %s706_s11  ;;  %s205_s15 = scalar_lea.vmem [#allocation3], %s686_s10 }
  0x13   : > { %s213_s16 = sshll.u32 %s205_s15, 4  ;;  %p1029_p0 = pnand %p754_p13, %p999_p4  ;;  %s214_s16 = int_to_ptr.vmem [resolvable:$true] %s213_s16 }
  0x14   : > { %p689_p1 = scmp.ge.s32.totalorder %s920_s23, 1  ;;  %s202_s24 = scalar_lea.sflag [#allocation4], %s201_s9 }
  0x15   : > { %p814_p2 = pneg %p1029_p0  ;;  %s825_s25 = scalar_lea.vmem %s214_s16, 1024 }
  0x16   : > { %p826_p3 = scmp.ne.s32.totalorder %s214_s16, %s825_s25  ;;  %s922_s27 = smov [#allocation3]  }
  0x17   : > { %s830_s29 = sshll.u32 %s922_s27, 4  ;;  %s831_s29 = int_to_ptr.vmem [resolvable:$false] %s830_s29 }
  0x18   : > { %p828_p5 = pnand %p826_p3, %p814_p2  ;;  %s832_s10 = scalar_lea.vmem %s831_s29, 2048 }
  0x19   : > { %p833_p7 = scmp.lt.s32.totalorder %s214_s16, %s831_s29  ;;  %p834_p10 = scmp.lt.s32.totalorder %s832_s10, %s825_s25 }
  0x1a   : > { %p829_p6 = pneg %p828_p5 }
  0x1b   : > { %p835_p12 = por %p834_p10, %p833_p7 }
  0x1d   : > { %p836_p4 = pnand %p835_p12, %p829_p6 }
  0x1f   : > { %839 = shalt.err (!%p836_p4)
}
  0x20   : > { %s923_s28 = smov 128   ;;  %s924_s9 = smov 8  }
  0x21   : > { %749 = dma.hbm_to_vmem [thread:$0]  (!%p1029_p0), %s212_s14, 1024, %s214_s16, %s202_s24, %s923_s28, %s923_s28, %s924_s9  }
  0x22   : > { %p221_p13 = scmp.lt.s32.totalorder %s920_s23, 3 }
  0x24   : > { %p222_p2 = pnand %p689_p1, %p221_p13 }
  0x25   : > { %s1042_s11 = sand.u32 (!%p222_p2), 1, %s904_s19  }
  0x26   : > { %225 = sbr.rel (%p222_p2) target bundleno = 638 (0x27e), region = 40  ;;  %s690_s12 = sshll.u32 (!%p222_p2), %s1042_s11, 6 }
  0x27   : > { %s228_s13 = scalar_lea.sflag (!%p222_p2), [#allocation4], %s1042_s11  ;;  %s231_s15 = scalar_lea.vmem (!%p222_p2), [#allocation3], %s690_s12 }
  0x2b   : > { %891 = dma.done.wait (%p1005_p8), %s228_s13, 1024  }
  0x2c   : > { %893 = vsyncadd (%p1005_p8), %s228_s13, 4294966272  ;;  %v269_v0 = vld [vmem:[%s231_s15] sm:$0xff]  ;;  %v271_v1 = vld [vmem:[%s231_s15 + $0x10] sm:$0xff]  ;;  %v925_v8 = vmov 0.0   ;;  %vm401_vm0 = vcmask 523264   ;;  %vm926_vm1 = vmmov 0   ;;  %v346_v17 = vlaneseq }
  0x2d   : > { %312 = vadd.xlane.f32.xlu0 %v269_v0  ;;  %316 = vadd.xlane.f32.xlu1 %v271_v1  ;;  %v270_v2 = vld [vmem:[%s231_s15 + $0x8] sm:$0xff]  ;;  %v272_v3 = vld [vmem:[%s231_s15 + $0x18] sm:$0xff]  ;;  %v273_v4 = vld [vmem:[%s231_s15 + $0x20] sm:$0xff]  ;;  %vm487_vm2 = vcmask 31744   ;;  %vm357_vm3 = vcmask 130112   ;;  %vm364_vm4 = vcmask 195712  }
  0x2e   : > { %v274_v5 = vld [vmem:[%s231_s15 + $0x28] sm:$0xff]  ;;  %v275_v6 = vld [vmem:[%s231_s15 + $0x30] sm:$0xff]  ;;  %v276_v7 = vld [vmem:[%s231_s15 + $0x38] sm:$0xff]  ;;  %718 = vmatprep.subr.mxu0 %v925_v8  ;;  %723 = vmatprep.subr.mxu1 %v925_v8  ;;  %v347_v18 = vand.u32 127, %v346_v17  ;;  %v349_v19 = vshrl.u32 %v346_v17, 7  ;;  %vm371_vm5 = vcmask 261312  }
  0x2f   : > { %v336_v9 = vld [vmem:[%s1142_s1] sm:$0xf]  ;;  %720 = vmatprep.mubr.msk.f32.mxu0 %vm926_vm1, %v925_v8  ;;  %739 = vmatprep.mubr.msk.f32.mxu1 %vm926_vm1, %v925_v8  ;;  %v485_v10 = vld [vmem:[%s1144_s3 + $0x38] sm:$0xff]  ;;  %v484_v11 = vld [vmem:[%s1144_s3 + $0x30] sm:$0xff]  ;;  %vm378_vm6 = vcmask 326912   ;;  %vm385_vm7 = vcmask 392512  }
  0x30   : > { %719 = vmatpush3.xpose.msk.msra.mxu0 %vm401_vm0, %v336_v9  ;;  %724 = vmatpush3.xpose.msk.msra.mxu1 %vm487_vm2, %v485_v10  ;;  %v483_v12 = vld [vmem:[%s1144_s3 + $0x28] sm:$0xff]  ;;  %v482_v13 = vld [vmem:[%s1144_s3 + $0x20] sm:$0xff]  ;;  %v481_v14 = vld [vmem:[%s1144_s3 + $0x18] sm:$0xff]  ;;  %v352_v20 = vadd.s32 4294967288, %v347_v18  ;;  %v366_v21 = vadd.s32 4294967272, %v347_v18  ;;  %v359_v23 = vadd.s32 4294967280, %v347_v18  ;;  %v350_v26 = vsub.s32 %v347_v18, %v349_v19 }
  0x31   : > { %314 = vadd.xlane.f32.xlu0 %v270_v2  ;;  %318 = vadd.xlane.f32.xlu1 %v272_v3  ;;  %v480_v15 = vld [vmem:[%s1144_s3 + $0x10] sm:$0xff]  ;;  %v479_v16 = vld [vmem:[%s1144_s3 + $0x8] sm:$0xff]  ;;  %v373_v25 = vadd.s32 4294967264, %v347_v18  ;;  %v380_v34 = vadd.s32 4294967256, %v347_v18  ;;  %v387_v38 = vadd.s32 4294967248, %v347_v18  ;;  %v394_v42 = vadd.s32 4294967240, %v347_v18 }
  0x32   : > { %725 = vmatprep.subr.mxu1 %v925_v8  ;;  %v355_v28 = vsub.s32 %v352_v20, %v349_v19  ;;  %v369_v29 = vsub.s32 %v366_v21, %v349_v19  ;;  %v362_v30 = vsub.s32 %v359_v23, %v349_v19  ;;  %vm392_vm8 = vcmask 458112   ;;  %v478_v2 = vld [vmem:[%s1144_s3] sm:$0xff]  ;;  %s703_s10 = sshll.u32 %s912_s21, 4  ;;  %s256_s28 = scalar_lea.vmem [#allocation6], %s1042_s11 }
  0x33   : > { %v376_v37 = vsub.s32 %v373_v25, %v349_v19  ;;  %v383_v45 = vsub.s32 %v380_v34, %v349_v19  ;;  %v390_v53 = vsub.s32 %v387_v38, %v349_v19  ;;  %v397_v54 = vsub.s32 %v394_v42, %v349_v19  ;;  %v337_v3 = vld [vmem:[%s1143_s2] sm:$0x1]  ;;  %s606_s9 = sshll.u32 %s256_s28, 4  ;;  %s1099_s15 = scalar_lea.hbm %s1146_s5, %s703_s10  ;;  %s607_s9 = int_to_ptr.vmem [resolvable:$true] %s606_s9 }
  0x34   : > { %726 = vmatpush3.xpose.msk.msra.mxu1 %vm487_vm2, %v484_v11  ;;  %vm399_vm9 = vcmask 523712   ;;  %vm591_vm10 = vcmask 516096   ;;  %s594_s30 = scalar_lea.sflag [#allocation5], %s1042_s11  ;;  %s840_s14 = scalar_lea.vmem %s607_s9, 16 }
  0x35   : > { %320 = vadd.xlane.f32.xlu0 %v273_v4  ;;  %322 = vadd.xlane.f32.xlu1 %v274_v5  ;;  %p841_p8 = scmp.ne.s32.totalorder %s607_s9, %s840_s14  ;;  %s927_s16 = smov [#allocation6]  }
  0x36   : > { %727 = vmatprep.subr.mxu1 %v925_v8  ;;  %s844_s17 = sshll.u32 %s927_s16, 4  ;;  %s845_s17 = int_to_ptr.vmem [resolvable:$false] %s844_s17 }
  0x37   : > { %p842_p12 = pnand %p841_p8, %p1009_p9  ;;  %s846_s21 = scalar_lea.vmem %s845_s17, 32 }
  0x38   : > { %728 = vmatpush3.xpose.msk.msra.mxu1 %vm487_vm2, %v483_v12  ;;  %p847_p1 = scmp.lt.s32.totalorder %s607_s9, %s845_s17  ;;  %p848_p3 = scmp.lt.s32.totalorder %s846_s21, %s840_s14 }
  0x39   : > { %324 = vadd.xlane.f32.xlu0 %v275_v6  ;;  %326 = vadd.xlane.f32.xlu1 %v276_v7  ;;  %p843_p0 = pneg %p842_p12 }
  0x3a   : > { %729 = vmatprep.subr.mxu1 %v925_v8  ;;  %p849_p5 = por %p848_p3, %p847_p1 }
  0x3c   : > { %730 = vmatpush3.xpose.msk.msra.mxu1 %vm487_vm2, %v482_v13  ;;  %p850_p6 = pnand %p849_p5, %p843_p0 }
  0x3d   : > { %731 = vmatprep.subr.mxu1 %v925_v8 }
  0x40   : > { %732 = vmatpush3.xpose.msk.msra.mxu1 %vm487_vm2, %v481_v14 }
  0x41   : > { %733 = vmatprep.subr.mxu1 %v925_v8 }
  0x44   : > { %734 = vmatpush3.xpose.msk.msra.mxu1 %vm487_vm2, %v480_v15 }
  0x45   : > { %735 = vmatprep.subr.mxu1 %v925_v8 }
  0x48   : > { %736 = vmatpush3.xpose.msk.msra.mxu1 %vm487_vm2, %v479_v16 }
  0x49   : > { %737 = vmatprep.subr.mxu1 %v925_v8  ;;  %v486_v8 = vld [vmem:[%s1145_s4] sm:$0x1] }
  0x4c   : > { %738 = vmatpush3.xpose.msk.msra.mxu1 %vm487_vm2, %v478_v2 }
  0xb6   : > { %v313_v22 = vpop.xlane.xlu0 %312  ;;  %v317_v24 = vpop.xlane.xlu1 %316 }
  0xb7   : > { %v328_v27 = vmul.f32 0.015625, %v313_v22  ;;  %v330_v31 = vmul.f32 0.015625, %v317_v24 }
  0xb9   : > { %v351_v39 = vrot.slane %v328_v27, %v350_v26  ;;  %v363_v43 = vrot.slane %v330_v31, %v362_v30 }
  0xba   : > { %v315_v32 = vpop.xlane.xlu0 %314  ;;  %v319_v33 = vpop.xlane.xlu1 %318 }
  0xbb   : > { %v329_v35 = vmul.f32 0.015625, %v315_v32  ;;  %v331_v36 = vmul.f32 0.015625, %v319_v33 }
  0xbd   : > { %v356_v40 = vrot.slane %v329_v35, %v355_v28  ;;  %v370_v41 = vrot.slane %v331_v36, %v369_v29 }
  0xbe   : > { %v321_v44 = vpop.xlane.xlu0 %320  ;;  %v323_v46 = vpop.xlane.xlu1 %322 }
  0xbf   : > { %v358_v47 = vsel %vm357_vm3, %v356_v40, %v351_v39  ;;  %v332_v48 = vmul.f32 0.015625, %v321_v44  ;;  %v333_v49 = vmul.f32 0.015625, %v323_v46 }
  0xc0   : > { %v365_v50 = vsel %vm364_vm4, %v363_v43, %v358_v47 }
  0xc1   : > { %v372_v51 = vsel %vm371_vm5, %v370_v41, %v365_v50  ;;  %v377_v52 = vrot.slane %v332_v48, %v376_v37  ;;  %v384_v55 = vrot.slane %v333_v49, %v383_v45 }
  0xc2   : > { %v325_v56 = vpop.xlane.xlu0 %324  ;;  %v327_v57 = vpop.xlane.xlu1 %326 }
  0xc3   : > { %v379_v58 = vsel %vm378_vm6, %v377_v52, %v372_v51  ;;  %v334_v59 = vmul.f32 0.015625, %v325_v56  ;;  %v335_v60 = vmul.f32 0.015625, %v327_v57 }
  0xc4   : > { %v386_v63 = vsel %vm385_vm7, %v384_v55, %v379_v58 }
  0xc5   : > { %v391_v61 = vrot.slane %v334_v59, %v390_v53  ;;  %v398_v62 = vrot.slane %v335_v60, %v397_v54 }
  0xc7   : > { %v393_v0 = vsel %vm392_vm8, %v391_v61, %v386_v63 }
  0xc8   : > { %v400_v1 = vsel %vm399_vm9, %v398_v62, %v393_v0 }
  0xc9   : > { %721 = vmatmul.mubr.msk.f32.vlgmr.msra.gmra.mxu0 %vm401_vm0, %v400_v1 }
 0x189   : > { %v473_v4 = vpop.f32.mrf.mxu0 }
 0x18a   : > { %v474_v5 = vadd.f32 %v473_v4, %v337_v3 }
 0x18b   : > { %v722_v6 = vpop.f32.mrf.mxu0 }
 0x18c   : > { %v477_v7 = vmax.f32 %v474_v5, 0.0 }
 0x18e   : > { %740 = vmatmul.mubr.msk.f32.vlgmr.msra.gmra.mxu1 %vm487_vm2, %v477_v7 }
 0x24e   : > { %v581_v9 = vpop.f32.mrf.mxu1 }
 0x24f   : > { %v582_v10 = vadd.f32 %v581_v9, %v486_v8 }
 0x250   : > { %v741_v11 = vpop.f32.mrf.mxu1 }
 0x251   : > { %v702_v12 = vmul.f32 -1.442695, %v582_v10 }
 0x253   : > { %808 = vpow2.f32 %v702_v12 }
 0x260   : > { %v809_v13 = vpop.eup %808 }
 0x261   : > { %v588_v14 = vadd.f32 1.0, %v809_v13 }
 0x263   : > { %810 = vrcp.f32 %v588_v14 }
 0x270   : > { %v811_v15 = vpop.eup %810 }
 0x271   : > { %592 = vst.msk [vmem:[%s256_s28] sm:$0x1] %vm591_vm10, %v811_v15 }
 0x272   : > { %853 = shalt.err (!%p850_p6)
}
 0x273   : > { %s854_s24 = scalar_lea.hbm %s1099_s15, 16  ;;  %s858_s27 = scalar_lea.hbm %s1146_s5, 32 }
 0x274   : > { %p855_p7 = scmp.ne.s32.totalorder %s1099_s15, %s854_s24  ;;  %p859_p13 = scmp.lt.s32.totalorder %s1099_s15, %s1146_s5 }
 0x275   : > { %p860_p2 = scmp.lt.s32.totalorder %s858_s27, %s854_s24 }
 0x276   : > { %p856_p10 = pnand %p855_p7, %p1009_p9 }
 0x277   : > { %p861_p8 = por %p860_p2, %p859_p13 }
 0x278   : > { %p857_p4 = pneg %p856_p10 }
 0x27a   : > { %p862_p12 = pnand %p861_p8, %p857_p4 }
 0x27c   : > { %865 = shalt.err (!%p862_p12)
}
 0x27d   : > { %744 = dma.vmem_to_hbm [thread:$0]  (%p1009_p9), %s607_s9, 16, %s1099_s15, %s594_s30  }
 0x27e PF: > { %s618_s28 = sand.u32 1, %s900_s18   ;;  %p1152_p0 = scmp.ge.s32.totalorder %s920_s23, 2 }
 0x27f   : > { %s619_s12 = scalar_lea.sflag [#allocation5], %s618_s28 }
 0x280   : > { %p751_p1 = pnand %p1152_p0, %p1016_p11 }
 0x282   : > { %p752_p3 = pneg %p751_p1 }
 0x284   : > { %895 = dma.done.wait (%p752_p3), %s619_s12, 16  }
 0x285   : > { %897 = vsyncadd (%p752_p3), %s619_s12, 4294967280  ;;  %s21_s23 = sadd.s32 1, %s920_s23   ;;  %s1153_s18 = smov %s904_s19 }
 0x286   : > { %p18_p5 = scmp.ge.s32.totalorder %s21_s23, 4   ;;  %s1154_s19 = smov %s908_s20 }
 0x287   : > { %s1155_s20 = smov %s1014_s7  ;;  %s1156_s21 = smov %s916_s22 }
 0x288   : > { %s1157_s22 = smov %s1159_s26  ;;  %20 = sbr.rel (!%p18_p5) target bundleno = 6 (0x6), region = 93 }
 0x28d   :  { %623 = vsyncpa [#allocation4], 1 }
 0x28e   :  { %625 = vsyncpa [#allocation4 + $0x1], 1 }
 0x28f   :  { %626 = vsyncpa [#allocation5], 1 }
 0x290   :  { %628 = vsyncpa [#allocation5 + $0x1], 1 }

</bundles_post_ra>
